<compile_context>
chip_gen: v7x
topology: tpu7x:2x2x1
jax: 0.10.0
libtpu: 0.0.40
codegen_flags: <defaults>
</compile_context>

<pallas_src>
import functools
import math

import jax
import jax.numpy as jnp
from jax import lax
from jax.experimental import pallas as pl
from jax.experimental.pallas import tpu as pltpu


_NEG_CAP = -1e30  # finite floor for the running max (avoids inf - inf -> NaN)


# --------------------------------------------------------------------------- #
# Fused QKV projection kernel (hoisted out of the attention kernel)
# --------------------------------------------------------------------------- #
def _proj_kernel(x_ref, wq_ref, wk_ref, wv_ref, q_ref, k_ref, v_ref):
    x = x_ref[0]                                                   # (Tp, E)
    q_ref[0] = jnp.dot(x, wq_ref[...],
                       preferred_element_type=jnp.float32).astype(q_ref.dtype)
    k_ref[0] = jnp.dot(x, wk_ref[...],
                       preferred_element_type=jnp.float32).astype(k_ref.dtype)
    v_ref[0] = jnp.dot(x, wv_ref[...],
                       preferred_element_type=jnp.float32).astype(v_ref.dtype)


def _project_qkv(x, wq_p, wk_p, wv_p, *, tile, compute_dtype):
    """q = x @ Wq (scale folded), k = x @ Wk, v = x @ Wv — one pass over x."""
    B, S, E = x.shape
    nt = S // tile
    bytes_c = jnp.dtype(compute_dtype).itemsize

    row_map = lambda b, i: (b, i, 0)
    w_map = lambda b, i: (0, 0)
    w_spec = pl.BlockSpec((E, E), w_map, pipeline_mode=pl.Buffered(1))

    est = (2 * tile * E * bytes_c            # x tile, double buffered
           + 3 * E * E * bytes_c             # weights, single buffered
           + 3 * 2 * tile * E * bytes_c)     # q/k/v tiles, double buffered
    vmem_limit = int(min(max(2 * est + (4 << 20), 32 << 20), 64 << 20))

    out_sds = jax.ShapeDtypeStruct((B, S, E), compute_dtype)
    return pl.pallas_call(
        _proj_kernel,
        out_shape=(out_sds, out_sds, out_sds),
        grid_spec=pltpu.PrefetchScalarGridSpec(
            num_scalar_prefetch=0,
            grid=(B, nt),
            in_specs=[pl.BlockSpec((1, tile, E), row_map),
                      w_spec, w_spec, w_spec],
            out_specs=(pl.BlockSpec((1, tile, E), row_map),
                       pl.BlockSpec((1, tile, E), row_map),
                       pl.BlockSpec((1, tile, E), row_map))),
        compiler_params=pltpu.CompilerParams(
            dimension_semantics=("parallel", "parallel"),
            vmem_limit_bytes=vmem_limit),
        cost_estimate=pl.CostEstimate(
            flops=int(3 * 2 * B * S * E * E),
            transcendentals=0,
            bytes_accessed=int(4 * B * S * E * bytes_c + 3 * E * E * bytes_c)),
    )(x, wq_p, wk_p, wv_p)


# --------------------------------------------------------------------------- #
# Windowed flash-attention kernel (+ fused output projection)
# --------------------------------------------------------------------------- #
def _swa_kernel(q_ref, k_ref, v_ref, wo_ref, o_ref,
                m_scr, l_scr, acc_scr, *,
                num_heads, head_dim, block, window_size, is_causal,
                kv_back, n_blocks, compute_dtype, approx_recip):
    # q_ref/k_ref/v_ref: (1, T, E) pre-projected activations (Q already scaled)
    # wo_ref:            (E, E)    output projection (single buffered)
    # o_ref:             (1, T, E)
    # m_scr, l_scr:      (T, H) f32 online-softmax running max / denominator
    # acc_scr:           (T, E) f32 lane-contiguous per-head context accumulator
    qi = pl.program_id(1)
    s = pl.program_id(2)
    n_kv = pl.num_programs(2)
    T = block
    H = num_heads
    Dh = head_dim

    kv_blk = qi - kv_back + s                       # un-clamped kv block index
    valid = jnp.logical_and(kv_blk >= 0, kv_blk < n_blocks)

    q_lo = qi * T
    k_lo = kv_blk * T
    q_hi = q_lo + (T - 1)
    k_hi = k_lo + (T - 1)

    # ---- per-query-tile init (first kv step) --------------------------------
    @pl.when(s == 0)
    def _init():
        m_scr[...] = jnp.full(m_scr.shape, -jnp.inf, jnp.float32)
        l_scr[...] = jnp.zeros(l_scr.shape, jnp.float32)
        acc_scr[...] = jnp.zeros(acc_scr.shape, jnp.float32)

    # ---- one key/value tile of the sliding window ---------------------------
    def _attend(apply_mask):
        q = q_ref[0]                                                   # (T, E)
        k = k_ref[0]
        v = v_ref[0]

        if apply_mask:
            row = q_lo + lax.broadcasted_iota(jnp.int32, (T, T), 0)
            col = k_lo + lax.broadcasted_iota(jnp.int32, (T, T), 1)
            if is_causal:
                band = jnp.logical_and(col <= row,
                                       col >= row - (window_size - 1))
            else:
                half = window_size // 2
                band = jnp.abs(row - col) <= half

        m_prev_all = m_scr[...]                                        # (T, H)
        l_prev_all = l_scr[...]                                        # (T, H)

        m_cols, l_cols, alpha_slabs, pv_slabs = [], [], [], []
        # TODO(synk): for large num_heads (>=8) switch this static unroll to
        # lax.fori_loop to bound vreg live ranges.
        for h in range(H):
            lo = h * Dh
            qh = q[:, lo:lo + Dh]                                      # (T, Dh)
            kh = k[:, lo:lo + Dh]
            vh = v[:, lo:lo + Dh]

            # scores = qh @ kh^T (contraction on the last dim of both).
            sc = lax.dot_general(qh, kh, (((1,), (1,)), ((), ())),
                                 preferred_element_type=jnp.float32)  # (T, T)
            if apply_mask:
                sc = jnp.where(band, sc, -jnp.inf)

            m_prev = m_prev_all[:, h:h + 1]                            # (T, 1)
            m_new = jnp.maximum(m_prev, jnp.max(sc, axis=-1, keepdims=True))
            m_new = jnp.maximum(m_new, _NEG_CAP)   # finite even if fully masked
            alpha = jnp.exp(m_prev - m_new)
            p = jnp.exp(sc - m_new)                # masked entries -> exactly 0
            l_new = alpha * l_prev_all[:, h:h + 1] + \
                jnp.sum(p, axis=-1, keepdims=True)
            pv = jnp.dot(p.astype(compute_dtype), vh,
                         preferred_element_type=jnp.float32)           # (T, Dh)

            m_cols.append(m_new)
            l_cols.append(l_new)
            alpha_slabs.append(jnp.broadcast_to(alpha, (T, Dh)))
            pv_slabs.append(pv)

        # Lane-dense scratch updates: one full-width write each instead of H
        # sub-128-lane partial stores.
        m_scr[...] = jnp.concatenate(m_cols, axis=1)                   # (T, H)
        l_scr[...] = jnp.concatenate(l_cols, axis=1)                   # (T, H)
        alpha_full = jnp.concatenate(alpha_slabs, axis=1)              # (T, E)
        pv_full = jnp.concatenate(pv_slabs, axis=1)                    # (T, E)
        acc_scr[...] = alpha_full * acc_scr[...] + pv_full

    # Tile-is-entirely-inside-the-band predicate (scalar): interior tiles take
    # a mask-free fast path, only (<=2) boundary tiles pay for the band mask.
    if is_causal:
        interior = jnp.logical_and(k_hi <= q_lo,
                                   k_lo >= q_hi - (window_size - 1))
    else:
        half = window_size // 2
        interior = jnp.logical_and(q_hi - k_lo <= half, k_hi - q_lo <= half)

    @pl.when(jnp.logical_and(valid, interior))
    def _fast():
        _attend(False)

    @pl.when(jnp.logical_and(valid, jnp.logical_not(interior)))
    def _boundary():
        _attend(True)

    # ---- finalize: vectorized normalize, fused output projection ------------
    @pl.when(s == n_kv - 1)
    def _finalize():
        inv_all = pl.reciprocal(l_scr[...], approx=approx_recip)       # (T, H)
        scale = jnp.concatenate(
            [jnp.broadcast_to(inv_all[:, h:h + 1], (T, Dh)) for h in range(H)],
            axis=1)                                                    # (T, E)
        ctx = (acc_scr[...] * scale).astype(compute_dtype)
        out = jnp.dot(ctx, wo_ref[...], preferred_element_type=jnp.float32)
        o_ref[0] = out.astype(o_ref.dtype)


# --------------------------------------------------------------------------- #
# Host-side helpers
# --------------------------------------------------------------------------- #
def prepare_swa_params(wq, wk, wv, wo, *, num_heads, compute_dtype=jnp.bfloat16):
    """One-time weight prep (call at model init, not per forward).

    wq/wk/wv/wo are (E, E) in PyTorch nn.Linear layout (out_features,
    in_features).  Returns input-major matrices with the 1/sqrt(head_dim)
    softmax scale folded into the Q projection, cast to the compute dtype.
    """
    E = wq.shape[0]
    head_dim = E // num_heads
    scale = 1.0 / math.sqrt(head_dim)
    return ((wq.T * scale).astype(compute_dtype),
            wk.T.astype(compute_dtype),
            wv.T.astype(compute_dtype),
            wo.T.astype(compute_dtype))


def _pick_tile(S, block_q, min_mult):
    """Largest MXU-friendly tile <= block_q dividing S.

    Preference order: multiples of 256 (v6e/v7x MXU), then 128, then the
    minimum packing multiple (16 for bf16, 8 for f32).  Falls back to the full
    sequence (always layout-legal because the block equals the array dim).
    """
    if S <= block_q:
        return S
    for pref in (256, 128, min_mult):
        if pref > block_q:
            continue
        cand = (block_q // pref) * pref
        while cand >= pref:
            if S % cand == 0:
                return cand
            cand -= pref
    return S


def sliding_window_attention(x, wq_p, wk_p, wv_p, wo_p, *, num_heads,
                             window_size, is_causal=True, block_q=256,
                             compute_dtype=jnp.bfloat16, approx_recip=None):
    """x: (B, S, E); wq_p/wk_p/wv_p/wo_p from prepare_swa_params."""
    B, S, E = x.shape
    assert E % num_heads == 0
    assert window_size >= 1
    Dh = E // num_heads
    out_dtype = x.dtype
    bytes_c = jnp.dtype(compute_dtype).itemsize
    if approx_recip is None:
        # approx reciprocal (EUP) is ~1e-3 rel error; keep exact for f32 parity.
        approx_recip = jnp.dtype(compute_dtype) != jnp.dtype(jnp.float32)

    min_mult = 8 if jnp.dtype(compute_dtype) == jnp.dtype(jnp.float32) else 16
    T = _pick_tile(S, block_q, min_mult)
    nq = S // T

    # Number of kv tiles that can intersect one query tile's window.
    if is_causal:
        n_kv = min(1 + pl.cdiv(window_size - 1, T), nq)
        back = n_kv - 1
    else:
        half = window_size // 2
        back = min(pl.cdiv(half, T), nq - 1)
        fwd = min((T - 1 + half) // T, nq - 1)
        n_kv = back + fwd + 1

    x_c = x.astype(compute_dtype)

    # Hoisted fused QKV projection: each row of x is projected exactly once.
    q, k, v = _project_qkv(x_c, wq_p, wk_p, wv_p, tile=T,
                           compute_dtype=compute_dtype)

    kernel = functools.partial(
        _swa_kernel, num_heads=num_heads, head_dim=Dh, block=T,
        window_size=window_size, is_causal=is_causal, kv_back=back,
        n_blocks=nq, compute_dtype=compute_dtype, approx_recip=approx_recip)

    def q_map(b, qi, s):
        return (b, qi, 0)

    def kv_map(b, qi, s):
        return (b, jnp.clip(qi - back + s, 0, nq - 1), 0)

    def w_map(b, qi, s):
        return (0, 0)

    est_vmem = (3 * 2 * T * E * bytes_c                       # q/k/v tiles x2
                + 2 * T * E * jnp.dtype(out_dtype).itemsize   # out tile x2
                + E * E * bytes_c                             # Wo (1 buffer)
                + 2 * T * 128 * 4                             # m/l (lane-padded)
                + T * E * 4)                                  # acc f32
    vmem_limit = int(min(max(2 * est_vmem + (4 << 20), 32 << 20), 64 << 20))

    flops = (2 * B * S * E * E                                # output proj
             + 4 * B * nq * n_kv * num_heads * T * T * Dh)    # scores + p@V
    transc = B * nq * n_kv * num_heads * T * T                # exp
    bytes_accessed = (B * S * E * bytes_c                     # q
                      + 2 * B * nq * n_kv * T * E * bytes_c   # windowed k, v
                      + B * S * E * jnp.dtype(out_dtype).itemsize
                      + E * E * bytes_c)

    return pl.pallas_call(
        kernel,
        out_shape=jax.ShapeDtypeStruct((B, S, E), out_dtype),
        grid_spec=pltpu.PrefetchScalarGridSpec(
            num_scalar_prefetch=0,
            grid=(B, nq, n_kv),
            in_specs=[
                pl.BlockSpec((1, T, E), q_map),        # projected Q tile
                pl.BlockSpec((1, T, E), kv_map),       # windowed K tile
                pl.BlockSpec((1, T, E), kv_map),       # windowed V tile
                pl.BlockSpec((E, E), w_map,
                             pipeline_mode=pl.Buffered(1)),   # Wo, resident
            ],
            out_specs=pl.BlockSpec((1, T, E), q_map),
            scratch_shapes=[
                pltpu.VMEM((T, num_heads), jnp.float32),   # running max m
                pltpu.VMEM((T, num_heads), jnp.float32),   # running denom l
                pltpu.VMEM((T, E), jnp.float32),           # ctx accumulator
            ]),
        compiler_params=pltpu.CompilerParams(
            dimension_semantics=("parallel", "parallel", "arbitrary"),
            vmem_limit_bytes=vmem_limit),
        cost_estimate=pl.CostEstimate(flops=int(flops),
                                      transcendentals=int(transc),
                                      bytes_accessed=int(bytes_accessed)),
    )(q, k, v, wo_p)


# --------------------------------------------------------------------------- #
# Pure-JAX reference mirroring the PyTorch forward
# --------------------------------------------------------------------------- #
def _reference(x, wq, wk, wv, wo, num_heads, window_size, is_causal):
    B, S, E = x.shape
    Dh = E // num_heads
    q = x @ wq.T
    k = x @ wk.T
    v = x @ wv.T

    def split(t):
        return jnp.transpose(t.reshape(B, S, num_heads, Dh), (0, 2, 1, 3))

    q, k, v = split(q), split(k), split(v)
    scores = jnp.einsum('bhqd,bhkd->bhqk', q, k) / (Dh ** 0.5)
    i = jnp.arange(S)[:, None]
    j = jnp.arange(S)[None, :]
    if is_causal:
        allowed = (j <= i) & (j >= i - window_size + 1)
    else:
        half = window_size // 2
        allowed = jnp.abs(i - j) <= half
    mask = jnp.where(allowed, 0.0, -jnp.inf)
    scores = scores + mask[None, None]
    probs = jax.nn.softmax(scores, axis=-1)
    ctx = jnp.einsum('bhqk,bhkd->bhqd', probs, v)
    ctx = jnp.transpose(ctx, (0, 2, 1, 3)).reshape(B, S, E)
    return ctx @ wo.T


if __name__ == "__main__":
    B, S, E = 2, 64, 32
    num_heads = 4

    key = jax.random.PRNGKey(0)
    kx, kq, kk, kv, ko = jax.random.split(key, 5)

    x = jax.random.normal(kx, (B, S, E), dtype=jnp.float32)
    w_scale = 1.0 / (E ** 0.5)
    wq = jax.random.uniform(kq, (E, E), jnp.float32, -w_scale, w_scale)
    wk = jax.random.uniform(kk, (E, E), jnp.float32, -w_scale, w_scale)
    wv = jax.random.uniform(kv, (E, E), jnp.float32, -w_scale, w_scale)
    wo = jax.random.uniform(ko, (E, E), jnp.float32, -w_scale, w_scale)

    p32 = prepare_swa_params(wq, wk, wv, wo, num_heads=num_heads,
                             compute_dtype=jnp.float32)
    p16 = prepare_swa_params(wq, wk, wv, wo, num_heads=num_heads,
                             compute_dtype=jnp.bfloat16)

    # --- causal, small window, f32 compute, multi-tile grid ------------------
    ref_c5 = _reference(x, wq, wk, wv, wo, num_heads, 5, True)
    out = jax.block_until_ready(sliding_window_attention(
        x, *p32, num_heads=num_heads, window_size=5, is_causal=True,
        block_q=16, compute_dtype=jnp.float32))
    assert out.shape == (B, S, E)
    assert jnp.allclose(out, ref_c5, atol=5e-3, rtol=5e-3), \
        "causal f32 mismatch vs reference"

    # --- causal, small window, bf16 fast path ---------------------------------
    out16 = jax.block_until_ready(sliding_window_attention(
        x, *p16, num_heads=num_heads, window_size=5, is_causal=True,
        block_q=16, compute_dtype=jnp.bfloat16))
    assert jnp.allclose(out16, ref_c5, atol=6e-2, rtol=6e-2), \
        "causal bf16 mismatch vs reference"

    # --- causal, wide window (exercises the mask-free interior fast path) -----
    ref_c40 = _reference(x, wq, wk, wv, wo, num_heads, 40, True)
    out_w = jax.block_until_ready(sliding_window_attention(
        x, *p32, num_heads=num_heads, window_size=40, is_causal=True,
        block_q=16, compute_dtype=jnp.float32))
    assert jnp.allclose(out_w, ref_c40, atol=5e-3, rtol=5e-3), \
        "causal wide-window f32 mismatch vs reference"

    # --- non-causal (symmetric window), f32 ------------------------------------
    ref_nc = _reference(x, wq, wk, wv, wo, num_heads, 5, False)
    out_nc = jax.block_until_ready(sliding_window_attention(
        x, *p32, num_heads=num_heads, window_size=5, is_causal=False,
        block_q=16, compute_dtype=jnp.float32))
    assert jnp.allclose(out_nc, ref_nc, atol=5e-3, rtol=5e-3), \
        "non-causal mismatch vs reference"

    # --- default tile picker (single full-sequence tile path) ------------------
    out_big = jax.block_until_ready(sliding_window_attention(
        x, *p32, num_heads=num_heads, window_size=5, is_causal=True,
        compute_dtype=jnp.float32))
    assert jnp.allclose(out_big, ref_c5, atol=5e-3, rtol=5e-3), \
        "single-tile path mismatch vs reference"

    print("KERNEL_OK")
</pallas_src>

<mosaic_0001>
module attributes {stable_mosaic.version = 11 : i64} {
  func.func @_proj_kernel(%arg0: i32, %arg1: i32, %arg2: memref<1x16x32xf32, #tpu.memory_space<vmem>>, %arg3: memref<32x32xf32, #tpu.memory_space<vmem>>, %arg4: memref<32x32xf32, #tpu.memory_space<vmem>>, %arg5: memref<32x32xf32, #tpu.memory_space<vmem>>, %arg6: memref<1x16x32xf32, #tpu.memory_space<vmem>>, %arg7: memref<1x16x32xf32, #tpu.memory_space<vmem>>, %arg8: memref<1x16x32xf32, #tpu.memory_space<vmem>>) attributes {dimension_semantics = [#tpu.dimension_semantics<parallel>, #tpu.dimension_semantics<parallel>], iteration_bounds = array<i64: 2, 4>, scalar_prefetch = 0 : i64, scratch_operands = 0 : i64, tpu.core_type = #tpu.core_type<tc>, window_params = [{transform_indices = @transform_0, window_bounds = array<i64: 1, 16, 32>}, {pipeline_mode = #tpu.pipeline_mode<synchronous>, transform_indices = @transform_1, window_bounds = array<i64: 32, 32>}, {pipeline_mode = #tpu.pipeline_mode<synchronous>, transform_indices = @transform_2, window_bounds = array<i64: 32, 32>}, {pipeline_mode = #tpu.pipeline_mode<synchronous>, transform_indices = @transform_3, window_bounds = array<i64: 32, 32>}, {transform_indices = @transform_4, window_bounds = array<i64: 1, 16, 32>}, {transform_indices = @transform_5, window_bounds = array<i64: 1, 16, 32>}, {transform_indices = @transform_6, window_bounds = array<i64: 1, 16, 32>}]} {
    %c0 = arith.constant 0 : index
    %c0_0 = arith.constant 0 : index
    %c0_1 = arith.constant 0 : index
    %0 = vector.load %arg2[%c0, %c0_0, %c0_1] : memref<1x16x32xf32, #tpu.memory_space<vmem>>, vector<1x16x32xf32>
    %1 = vector.shape_cast %0 : vector<1x16x32xf32> to vector<16x32xf32>
    %c0_2 = arith.constant 0 : index
    %c0_3 = arith.constant 0 : index
    %2 = vector.load %arg3[%c0_2, %c0_3] : memref<32x32xf32, #tpu.memory_space<vmem>>, vector<32x32xf32>
    %cst = arith.constant dense<0.000000e+00> : vector<16x32xf32>
    %3 = tpu.matmul %1, %2, %cst {dimension_numbers = #tpu.dot_dimension_numbers<[1], [0], [0], [1], [0, 0, 1, 1], [], []>} : vector<16x32xf32>, vector<32x32xf32>, vector<16x32xf32> -> vector<16x32xf32>
    %c0_4 = arith.constant 0 : index
    %c0_5 = arith.constant 0 : index
    %c0_6 = arith.constant 0 : index
    %4 = vector.load %arg6[%c0_4, %c0_5, %c0_6] : memref<1x16x32xf32, #tpu.memory_space<vmem>>, vector<1x16x32xf32>
    %5 = vector.shape_cast %4 : vector<1x16x32xf32> to vector<16x32xf32>
    %6 = vector.shape_cast %3 : vector<16x32xf32> to vector<1x16x32xf32>
    tpu.vector_store %arg6[%c0_4, %c0_5, %c0_6], %6 {strides = array<i32>} : memref<1x16x32xf32, #tpu.memory_space<vmem>>, vector<1x16x32xf32>,
    %c0_7 = arith.constant 0 : index
    %c0_8 = arith.constant 0 : index
    %7 = vector.load %arg4[%c0_7, %c0_8] : memref<32x32xf32, #tpu.memory_space<vmem>>, vector<32x32xf32>
    %cst_9 = arith.constant dense<0.000000e+00> : vector<16x32xf32>
    %8 = tpu.matmul %1, %7, %cst_9 {dimension_numbers = #tpu.dot_dimension_numbers<[1], [0], [0], [1], [0, 0, 1, 1], [], []>} : vector<16x32xf32>, vector<32x32xf32>, vector<16x32xf32> -> vector<16x32xf32>
    %c0_10 = arith.constant 0 : index
    %c0_11 = arith.constant 0 : index
    %c0_12 = arith.constant 0 : index
    %9 = vector.load %arg7[%c0_10, %c0_11, %c0_12] : memref<1x16x32xf32, #tpu.memory_space<vmem>>, vector<1x16x32xf32>
    %10 = vector.shape_cast %9 : vector<1x16x32xf32> to vector<16x32xf32>
    %11 = vector.shape_cast %8 : vector<16x32xf32> to vector<1x16x32xf32>
    tpu.vector_store %arg7[%c0_10, %c0_11, %c0_12], %11 {strides = array<i32>} : memref<1x16x32xf32, #tpu.memory_space<vmem>>, vector<1x16x32xf32>,
    %c0_13 = arith.constant 0 : index
    %c0_14 = arith.constant 0 : index
    %12 = vector.load %arg5[%c0_13, %c0_14] : memref<32x32xf32, #tpu.memory_space<vmem>>, vector<32x32xf32>
    %cst_15 = arith.constant dense<0.000000e+00> : vector<16x32xf32>
    %13 = tpu.matmul %1, %12, %cst_15 {dimension_numbers = #tpu.dot_dimension_numbers<[1], [0], [0], [1], [0, 0, 1, 1], [], []>} : vector<16x32xf32>, vector<32x32xf32>, vector<16x32xf32> -> vector<16x32xf32>
    %c0_16 = arith.constant 0 : index
    %c0_17 = arith.constant 0 : index
    %c0_18 = arith.constant 0 : index
    %14 = vector.load %arg8[%c0_16, %c0_17, %c0_18] : memref<1x16x32xf32, #tpu.memory_space<vmem>>, vector<1x16x32xf32>
    %15 = vector.shape_cast %14 : vector<1x16x32xf32> to vector<16x32xf32>
    %16 = vector.shape_cast %13 : vector<16x32xf32> to vector<1x16x32xf32>
    tpu.vector_store %arg8[%c0_16, %c0_17, %c0_18], %16 {strides = array<i32>} : memref<1x16x32xf32, #tpu.memory_space<vmem>>, vector<1x16x32xf32>,
    return
  }
  func.func @transform_0(%arg0: i32, %arg1: i32) -> (i32, i32, i32) {
    %c0_i32 = arith.constant 0 : i32
    %c0_i32_0 = arith.constant 0 : i32
    return %arg0, %arg1, %c0_i32 : i32, i32, i32
  }
  func.func @transform_1(%arg0: i32, %arg1: i32) -> (i32, i32) {
    %c0_i32 = arith.constant 0 : i32
    %c0_i32_0 = arith.constant 0 : i32
    %c0_i32_1 = arith.constant 0 : i32
    return %c0_i32, %c0_i32_0 : i32, i32
  }
  func.func @transform_2(%arg0: i32, %arg1: i32) -> (i32, i32) {
    %c0_i32 = arith.constant 0 : i32
    %c0_i32_0 = arith.constant 0 : i32
    %c0_i32_1 = arith.constant 0 : i32
    return %c0_i32, %c0_i32_0 : i32, i32
  }
  func.func @transform_3(%arg0: i32, %arg1: i32) -> (i32, i32) {
    %c0_i32 = arith.constant 0 : i32
    %c0_i32_0 = arith.constant 0 : i32
    %c0_i32_1 = arith.constant 0 : i32
    return %c0_i32, %c0_i32_0 : i32, i32
  }
  func.func @transform_4(%arg0: i32, %arg1: i32) -> (i32, i32, i32) {
    %c0_i32 = arith.constant 0 : i32
    %c0_i32_0 = arith.constant 0 : i32
    return %arg0, %arg1, %c0_i32 : i32, i32, i32
  }
  func.func @transform_5(%arg0: i32, %arg1: i32) -> (i32, i32, i32) {
    %c0_i32 = arith.constant 0 : i32
    %c0_i32_0 = arith.constant 0 : i32
    return %arg0, %arg1, %c0_i32 : i32, i32, i32
  }
  func.func @transform_6(%arg0: i32, %arg1: i32) -> (i32, i32, i32) {
    %c0_i32 = arith.constant 0 : i32
    %c0_i32_0 = arith.constant 0 : i32
    return %arg0, %arg1, %c0_i32 : i32, i32, i32
  }
}

</mosaic_0001>

<bundles_post_ra>
// kernel: tpu_custom_call.1
= control target key start
LH: loop header
LB: loop body
LE: loop exit
PB: predicated region body
PF: predicated region fallthrough
CT: control target
= control target key end

     0   :  { %s995_s21 = smov 0   ;;  %s997_s22 = smov 0   ;;  %s1109_s0 = inlined_call_operand.vmem [shape: f32[2,64,32], index: 0, kind: input, shape index: {}]   ;;  %s1110_s1 = inlined_call_operand.vmem [shape: f32[32,32], index: 1, kind: input, shape index: {}]   ;;  %s1111_s2 = inlined_call_operand.vmem [shape: f32[32,32], index: 2, kind: input, shape index: {}]   ;;  %s1112_s3 = inlined_call_operand.vmem [shape: f32[32,32], index: 3, kind: input, shape index: {}]   ;;  %s1113_s4 = inlined_call_operand.vmem [shape: f32[2,64,32], index: 4, kind: output, shape index: {0}]   ;;  %s1114_s5 = inlined_call_operand.vmem [shape: f32[2,64,32], index: 5, kind: output, shape index: {1}]   ;;  %s1115_s6 = inlined_call_operand.vmem [shape: f32[2,64,32], index: 6, kind: output, shape index: {2}]  }
   0x1   :  { %s999_s23 = smov 0   ;;  %s1001_s24 = smov 0  }
   0x2   :  { %s1003_s25 = smov 0  }
   0x3 LB: > { %s26_s26 = sadd.s32 1, %s950_s23  ;;  %s29_s27 = sadd.s32 1, %s954_s24  ;;  %s958_s25 = sphi %s1003_s25, %s17_s25   ;;  %s954_s24 = sphi %s1001_s24, %s1119_s24   ;;  %s950_s23 = sphi %s999_s23, %s1118_s23   ;;  %s946_s22 = sphi %s997_s22, %s1117_s22   ;;  %s942_s21 = sphi %s995_s21, %s1116_s21  }
   0x4   : > { %p27_p0 = scmp.ge.s32.totalorder %s26_s26, 4  ;;  %p784_p1 = scmp.ge.s32.totalorder %s958_s25, 1 }
   0x5   : > { %p242_p2 = scmp.lt.s32.totalorder %s958_s25, 9 }
   0x6   : > { %s1121_s26 = smov (%p27_p0, %s26_s26), 0  ;;  %s1123_s27 = smov (!%p27_p0, %s29_s27), %s954_s24 }
   0x7   : > { %p243_p3 = pnand %p784_p1, %p242_p2  ;;  %p31_p4 = scmp.ge.s32.totalorder %s1123_s27, 2 }
   0x8   : > { %v340_v0 = vld [vmem:[%s1110_s1] sm:$0xff] (!%p243_p3)  ;;  %v341_v1 = vld [vmem:[%s1110_s1 + $0x8] sm:$0xff] (!%p243_p3)  ;;  %v342_v2 = vld [vmem:[%s1110_s1 + $0x10] sm:$0xff] (!%p243_p3)  ;;  %s785_s10 = sshll.u32 (!%p243_p3), %s942_s21, 1  ;;  %p299_p5 = scmp.lt.s32.totalorder (!%p243_p3), %s946_s22, 1  ;;  %vm344_vm0 = vcmask (!%p243_p3), 261120  }
   0x9   : > { %s1125_s27 = smov (%p31_p4, %s1123_s27), 0  ;;  %246 = sbr.rel (%p243_p3) target bundleno = 245 (0xf5), region = 36 }
   0xa   : > { %v856_v3 = vpack.c.bf16 (!%p243_p3), %v341_v1, %v340_v0  ;;  %v343_v4 = vld [vmem:[%s1110_s1 + $0x18] sm:$0xff] (!%p243_p3)  ;;  %p301_p6 = scmp.lt.s32.totalorder (!%p243_p3), %s785_s10, 7  ;;  %v428_v5 = vld [vmem:[%s1111_s2] sm:$0xff] (!%p243_p3)  ;;  %v429_v6 = vld [vmem:[%s1111_s2 + $0x8] sm:$0xff] (!%p243_p3) }
   0xb   : > { %v860_v7 = vpack.c.bf16 (!%p243_p3), %v343_v4, %v342_v2  ;;  %v864_v8 = vpack.c.bf16 (!%p243_p3), %v429_v6, %v428_v5  ;;  %v509_v9 = vld [vmem:[%s1112_s3] sm:$0xff] (!%p243_p3)  ;;  %v510_v10 = vld [vmem:[%s1112_s3 + $0x8] sm:$0xff] (!%p243_p3)  ;;  %v430_v11 = vld [vmem:[%s1111_s2 + $0x10] sm:$0xff] (!%p243_p3) }
   0xc   : > { %857 = vmatprep.subr.bf16.mxu0 (!%p243_p3), %v856_v3  ;;  %v431_v12 = vld [vmem:[%s1111_s2 + $0x18] sm:$0xff] (!%p243_p3)  ;;  %v872_v14 = vpack.c.bf16 (!%p243_p3), %v510_v10, %v509_v9  ;;  %v511_v15 = vld [vmem:[%s1112_s3 + $0x10] sm:$0xff] (!%p243_p3) }
   0xd   : > { %859 = vmatpush3.bf16.msra.mxu0 (!%p243_p3), %v856_v3  ;;  %865 = vmatprep.subr.bf16.mxu1 (!%p243_p3), %v864_v8  ;;  %v868_v13 = vpack.c.bf16 (!%p243_p3), %v431_v12, %v430_v11  ;;  %v512_v16 = vld [vmem:[%s1112_s3 + $0x18] sm:$0xff] (!%p243_p3) }
   0xe   : > { %861 = vmatprep.subr.bf16.mxu0 (!%p243_p3), %v860_v7  ;;  %867 = vmatpush3.bf16.msra.mxu1 (!%p243_p3), %v864_v8  ;;  %v876_v19 = vpack.c.bf16 (!%p243_p3), %v512_v16, %v511_v15 }
   0xf   : > { %869 = vmatprep.subr.bf16.mxu1 (!%p243_p3), %v868_v13 }
  0x10   : > { %s1127_s22 = smov (!%p299_p5, %s946_s22), 1  ;;  %s1129_s10 = smov (!%p301_p6, %s785_s10), 7 }
  0x11   : > { %s786_s7 = sshll.u32 %s1127_s22, 3  ;;  %863 = vmatpush3.bf16.msra.mxu0 %v860_v7 }
  0x12   : > { %s304_s8 = sadd.s32 %s786_s7, %s1129_s10  ;;  %873 = vmatprep.subr.bf16.mxu0 %v872_v14  ;;  %871 = vmatpush3.bf16.msra.mxu1 %v868_v13 }
  0x13   : > { %s1058_s9 = sshll.u32 %s304_s8, 3 }
  0x14   : > { %s306_s16 = scalar_lea.vmem %s1109_s0, %s1058_s9  ;;  %s316_s18 = scalar_lea.vmem %s1113_s4, %s1058_s9 }
  0x15   : > { %v338_v17 = vld [vmem:[%s306_s16] sm:$0xff]  ;;  %v339_v18 = vld [vmem:[%s306_s16 + $0x8] sm:$0xff]  ;;  %s326_s21 = scalar_lea.vmem %s1114_s5, %s1058_s9  ;;  %s336_s30 = scalar_lea.vmem %s1115_s6, %s1058_s9 }
  0x16   : > { %831 = vmatprep.mubr.msk.f32.mxu0 %vm344_vm0, %v338_v17  ;;  %842 = vmatprep.mubr.msk.f32.mxu1 %vm344_vm0, %v338_v17 }
  0x17   : > { %832 = vmatmul.mubr.msk.f32.vlgmr.msra.gmra.mrb[0].mxu0 %vm344_vm0, %v339_v18  ;;  %843 = vmatmul.mubr.msk.f32.vlgmr.msra.gmra.mrb[0].mxu1 %vm344_vm0, %v339_v18 }
  0x18   : > { %875 = vmatpush3.bf16.msra.mxu0 %v872_v14  ;;  %853 = vmatprep.mubr.msk.f32.mxu0 %vm344_vm0, %v338_v17 }
  0x19   : > { %877 = vmatprep.subr.bf16.mxu0 %v876_v19 }
  0x1c   : > { %879 = vmatpush3.bf16.msra.mxu0 %v876_v19 }
  0x1f   : > { %854 = vmatmul.mubr.msk.f32.vlgmr.msra.gmra.mrb[2].mxu0 %vm344_vm0, %v339_v18 }
  0xea   : > { %v833_v20 = vpop.f32.mrb[0].mxu0  ;;  %v844_v22 = vpop.f32.mrb[0].mxu1 }
  0xeb   : > { %427 = vst.msk [vmem:[%s316_s18 + $0x8] sm:$0xff] %vm344_vm0, %v833_v20  ;;  %v417_v21 = vpop.f32.mrb[1].mxu0  ;;  %508 = vst.msk [vmem:[%s326_s21 + $0x8] sm:$0xff] %vm344_vm0, %v844_v22  ;;  %v498_v23 = vpop.f32.mrb[1].mxu1 }
  0xec   : > { %426 = vst.msk [vmem:[%s316_s18] sm:$0xff] %vm344_vm0, %v417_v21  ;;  %507 = vst.msk [vmem:[%s326_s21] sm:$0xff] %vm344_vm0, %v498_v23 }
  0xf2   : > { %v855_v24 = vpop.f32.mrb[2].mxu0 }
  0xf3   : > { %589 = vst.msk [vmem:[%s336_s30 + $0x8] sm:$0xff] %vm344_vm0, %v855_v24  ;;  %v579_v25 = vpop.f32.mrb[3].mxu0 }
  0xf4   : > { %588 = vst.msk [vmem:[%s336_s30] sm:$0xff] %vm344_vm0, %v579_v25 }
  0xf5 PF: > { %s17_s25 = sadd.s32 1, %s958_s25   ;;  %s1116_s21 = smov %s950_s23 }
  0xf6   : > { %p14_p7 = scmp.ge.s32.totalorder %s17_s25, 10   ;;  %s1117_s22 = smov %s954_s24 }
  0xf7   : > { %s1118_s23 = smov %s1121_s26  ;;  %s1119_s24 = smov %s1125_s27 }
  0xf8   :  { %16 = sbr.rel (!%p14_p7) target bundleno = 3 (0x3), region = 90 }

</bundles_post_ra>
